<compile_context>
chip_gen: v7x
topology: tpu7x:2x2x1
jax: 0.10.0
libtpu: 0.0.40
codegen_flags: <defaults>
</compile_context>

<pallas_src>
import functools

import jax
import jax.numpy as jnp
from jax import lax
from jax.experimental import pallas as pl
from jax.experimental.pallas import tpu as pltpu


_VMEM_LIMIT = 48 * 1024 * 1024  # explicit scoped-VMEM budget (safe on v5e/v6e/v7x)


def _pick_tm(m):
    """Largest row tile <=512 that divides M and leaves >=2 blocks (megacore)."""
    for cand in (512, 256, 128, 64, 32, 16, 8):
        if m % cand == 0 and m // cand >= 2:
            return cand
    return m


def _pick_tk(k):
    """K tile (multiple of 128) so VMEM use is bounded independent of K."""
    for cand in (512, 256):
        if k % cand == 0 and k // cand >= 2:
            return cand
    return k


# ---------------------------------------------------------------------------
# Kernel 1: 1x1 conv as K-tiled matmul + bias + optional ReLU
# ---------------------------------------------------------------------------
def _mm_bias_act_kernel(x_ref, w_ref, b_ref, o_ref, acc_ref, *, relu):
    @pl.when(pl.program_id(1) == 0)
    def _():
        acc_ref[...] = jnp.zeros_like(acc_ref)

    acc_ref[...] += jnp.dot(x_ref[...], w_ref[...],
                            preferred_element_type=jnp.float32)

    @pl.when(pl.program_id(1) == pl.num_programs(1) - 1)
    def _():
        out = acc_ref[...] + b_ref[...]
        if relu:
            out = jnp.maximum(out, 0.0)
        o_ref[...] = out.astype(o_ref.dtype)


def matmul_bias_act(x_mat, w, bias, *, relu, out_dtype=jnp.bfloat16):
    """out = maybe_relu(x_mat @ w + bias); bf16 operands, f32 accumulation."""
    m, k = x_mat.shape
    kw_, cout = w.shape
    assert k == kw_
    tm = _pick_tm(m)
    tk = _pick_tk(k)
    bias2 = bias.reshape(1, cout).astype(jnp.float32)
    grid = (pl.cdiv(m, tm), pl.cdiv(k, tk))
    return pl.pallas_call(
        functools.partial(_mm_bias_act_kernel, relu=relu),
        out_shape=jax.ShapeDtypeStruct((m, cout), out_dtype),
        grid=grid,
        in_specs=[
            pl.BlockSpec((tm, tk), lambda i, kk: (i, kk)),
            pl.BlockSpec((tk, cout), lambda i, kk: (kk, 0)),
            pl.BlockSpec((1, cout), lambda i, kk: (0, 0)),
        ],
        out_specs=pl.BlockSpec((tm, cout), lambda i, kk: (i, 0)),
        scratch_shapes=[pltpu.VMEM((tm, cout), jnp.float32)],
        compiler_params=pltpu.CompilerParams(
            dimension_semantics=("parallel", "arbitrary"),
            vmem_limit_bytes=_VMEM_LIMIT),
    )(x_mat, w, bias2)


# ---------------------------------------------------------------------------
# Kernel 2: 3x3 conv (stride, pad already applied) + bias + ReLU
# 9 taps accumulated in-kernel from the padded activation -- no HBM im2col.
# ---------------------------------------------------------------------------
def _conv3x3_bn_relu_kernel(xp_ref, w_ref, b_ref, o_ref, *, stride, ho, wo):
    c = xp_ref.shape[-1]
    cout = o_ref.shape[-1]
    acc = jnp.zeros((ho * wo, cout), jnp.float32)
    for kh in range(3):
        for kw in range(3):
            if stride == 1:
                xs = xp_ref[:, pl.ds(kh, ho), pl.ds(kw, wo), :]
            else:
                xs = xp_ref[:, pl.ds(kh, ho, stride), pl.ds(kw, wo, stride), :]
            xs = xs.reshape(ho * wo, c)
            acc = acc + jnp.dot(xs, w_ref[3 * kh + kw],
                                preferred_element_type=jnp.float32)
    out = jnp.maximum(acc + b_ref[...], 0.0)
    o_ref[...] = out.reshape(1, ho, wo, cout).astype(o_ref.dtype)


def conv3x3_bn_relu(xp, w9, bias, *, stride, out_dtype=jnp.bfloat16):
    """xp: (N, H+2, W+2, C) padded activation, w9: (9, C, Cout)."""
    n, hp, wp, c = xp.shape
    _, c2, cout = w9.shape
    assert c == c2
    ho = (hp - 3) // stride + 1
    wo = (wp - 3) // stride + 1
    bias2 = bias.reshape(1, cout).astype(jnp.float32)
    return pl.pallas_call(
        functools.partial(_conv3x3_bn_relu_kernel, stride=stride, ho=ho, wo=wo),
        out_shape=jax.ShapeDtypeStruct((n, ho, wo, cout), out_dtype),
        grid=(n,),
        in_specs=[
            pl.BlockSpec((1, hp, wp, c), lambda i: (i, 0, 0, 0)),
            pl.BlockSpec((9, c, cout), lambda i: (0, 0, 0)),
            pl.BlockSpec((1, cout), lambda i: (0, 0)),
        ],
        out_specs=pl.BlockSpec((1, ho, wo, cout), lambda i: (i, 0, 0, 0)),
        compiler_params=pltpu.CompilerParams(
            dimension_semantics=("parallel",),
            vmem_limit_bytes=_VMEM_LIMIT),
    )(xp, w9, bias2)


# ---------------------------------------------------------------------------
# Kernel 3: conv3 (1x1) + bn3 + residual (fused downsample conv or identity)
#           + ReLU, all in one grid step.
# ---------------------------------------------------------------------------
def _conv3_ds_fused_kernel(y_ref, w3_ref, b3_ref, xs_ref, wd_ref, bd_ref, o_ref):
    out = jnp.dot(y_ref[...], w3_ref[...], preferred_element_type=jnp.float32)
    out = out + b3_ref[...]
    res = jnp.dot(xs_ref[...], wd_ref[...], preferred_element_type=jnp.float32)
    res = res + bd_ref[...]
    o_ref[...] = jnp.maximum(out + res, 0.0).astype(o_ref.dtype)


def _conv3_id_fused_kernel(y_ref, w3_ref, b3_ref, r_ref, o_ref):
    out = jnp.dot(y_ref[...], w3_ref[...], preferred_element_type=jnp.float32)
    out = out + b3_ref[...] + r_ref[...].astype(jnp.float32)
    o_ref[...] = jnp.maximum(out, 0.0).astype(o_ref.dtype)


def conv3_residual_fused(y2_mat, w3, b3, *, residual=None, xs=None, wd=None,
                         bd=None, out_dtype=jnp.float32):
    m, kp = y2_mat.shape
    _, cout = w3.shape
    tm = _pick_tm(m)
    grid = (pl.cdiv(m, tm),)
    b3v = b3.reshape(1, cout).astype(jnp.float32)
    cp = pltpu.CompilerParams(dimension_semantics=("parallel",),
                              vmem_limit_bytes=_VMEM_LIMIT)
    out_shape = jax.ShapeDtypeStruct((m, cout), out_dtype)
    y_spec = pl.BlockSpec((tm, kp), lambda i: (i, 0))
    w3_spec = pl.BlockSpec((kp, cout), lambda i: (0, 0))
    vec_spec = pl.BlockSpec((1, cout), lambda i: (0, 0))
    o_spec = pl.BlockSpec((tm, cout), lambda i: (i, 0))

    if xs is not None:
        kd = xs.shape[1]
        bdv = bd.reshape(1, cout).astype(jnp.float32)
        return pl.pallas_call(
            _conv3_ds_fused_kernel,
            out_shape=out_shape, grid=grid,
            in_specs=[y_spec, w3_spec, vec_spec,
                      pl.BlockSpec((tm, kd), lambda i: (i, 0)),
                      pl.BlockSpec((kd, cout), lambda i: (0, 0)),
                      vec_spec],
            out_specs=o_spec, compiler_params=cp,
        )(y2_mat, w3, b3v, xs, wd, bdv)
    else:
        return pl.pallas_call(
            _conv3_id_fused_kernel,
            out_shape=out_shape, grid=grid,
            in_specs=[y_spec, w3_spec, vec_spec, o_spec],
            out_specs=o_spec, compiler_params=cp,
        )(y2_mat, w3, b3v, residual)


# ---------------------------------------------------------------------------
# Glue: BN folding into weights, parameter init, full BottleNeck forward
# ---------------------------------------------------------------------------
def fold_bn_into_conv(w, bn, eps=1e-5):
    """Fold eval-mode BN into the conv weight (bf16) + per-channel bias (f32)."""
    scale = bn["gamma"] / jnp.sqrt(bn["var"] + eps)
    bias = (bn["beta"] - bn["mean"] * scale).astype(jnp.float32)
    w_scaled = (w * scale).astype(jnp.bfloat16)   # broadcast over out-channel axis
    return w_scaled, bias


def init_params(key, inplanes, planes, stride):
    expansion = 4
    ks = jax.random.split(key, 8)

    def w_init(k, shape, fan_in):
        return jax.random.normal(k, shape, jnp.float32) * (2.0 / fan_in) ** 0.5

    def bn_init(k, c):
        k1, k2, k3, k4 = jax.random.split(k, 4)
        return dict(gamma=jax.random.uniform(k1, (c,), jnp.float32, 0.5, 1.5),
                    beta=jax.random.normal(k2, (c,), jnp.float32) * 0.1,
                    mean=jax.random.normal(k3, (c,), jnp.float32) * 0.1,
                    var=jax.random.uniform(k4, (c,), jnp.float32, 0.5, 1.5))

    p = {}
    p["w1"] = w_init(ks[0], (inplanes, planes), inplanes)                  # 1x1
    p["w2"] = w_init(ks[1], (3, 3, planes, planes), 9 * planes)            # 3x3 HWIO
    p["w3"] = w_init(ks[2], (planes, planes * expansion), planes)          # 1x1
    p["bn1"] = bn_init(ks[3], planes)
    p["bn2"] = bn_init(ks[4], planes)
    p["bn3"] = bn_init(ks[5], planes * expansion)
    if stride != 1 or expansion * planes != inplanes:
        p["wd"] = w_init(ks[6], (inplanes, planes * expansion), inplanes)  # 1x1
        p["bnd"] = bn_init(ks[7], planes * expansion)
    return p


def bottleneck_forward(x, p, stride):
    n, h, w, cin = x.shape
    planes = p["w1"].shape[1]
    cout = p["w3"].shape[1]

    w1, b1 = fold_bn_into_conv(p["w1"], p["bn1"])
    w2, b2 = fold_bn_into_conv(p["w2"], p["bn2"])
    w3, b3 = fold_bn_into_conv(p["w3"], p["bn3"])
    w2 = w2.reshape(9, planes, planes)                 # (kh*3+kw, Cin, Cout)

    xb = x.astype(jnp.bfloat16)

    # conv1 (1x1) + bn1 + relu
    y1 = matmul_bias_act(xb.reshape(n * h * w, cin), w1, b1, relu=True)
    y1 = y1.reshape(n, h, w, planes)

    # conv2 (3x3, stride, pad=1) + bn2 + relu (in-kernel 9-tap accumulation)
    y1p = jnp.pad(y1, ((0, 0), (1, 1), (1, 1), (0, 0)))
    y2 = conv3x3_bn_relu(y1p, w2, b2, stride=stride)
    _, ho, wo, _ = y2.shape

    # conv3 (1x1) + bn3 + residual-add + relu, residual branch fused in-kernel
    y2_mat = y2.reshape(n * ho * wo, planes)
    if "wd" in p:
        wd, bd = fold_bn_into_conv(p["wd"], p["bnd"])
        xs = xb[:, ::stride, ::stride, :].reshape(n * ho * wo, cin)
        out = conv3_residual_fused(y2_mat, w3, b3, xs=xs, wd=wd, bd=bd)
    else:
        out = conv3_residual_fused(y2_mat, w3, b3,
                                   residual=xb.reshape(n * h * w, cin))
    return out.reshape(n, ho, wo, cout)


# ---------------------------------------------------------------------------
# Pure-JAX reference (lax convs, f32) for correctness checking
# ---------------------------------------------------------------------------
def _bn_ref(x, bn, eps=1e-5):
    return (x - bn["mean"]) / jnp.sqrt(bn["var"] + eps) * bn["gamma"] + bn["beta"]


def reference_forward(x, p, stride):
    dn = ("NHWC", "HWIO", "NHWC")
    out = lax.conv_general_dilated(x, p["w1"][None, None], (1, 1), "VALID",
                                   dimension_numbers=dn)
    out = jax.nn.relu(_bn_ref(out, p["bn1"]))
    out = lax.conv_general_dilated(out, p["w2"], (stride, stride),
                                   ((1, 1), (1, 1)), dimension_numbers=dn)
    out = jax.nn.relu(_bn_ref(out, p["bn2"]))
    out = lax.conv_general_dilated(out, p["w3"][None, None], (1, 1), "VALID",
                                   dimension_numbers=dn)
    out = _bn_ref(out, p["bn3"])
    if "wd" in p:
        res = lax.conv_general_dilated(x, p["wd"][None, None], (stride, stride),
                                       "VALID", dimension_numbers=dn)
        res = _bn_ref(res, p["bnd"])
    else:
        res = x
    return jax.nn.relu(out + res)


if __name__ == "__main__":
    key = jax.random.PRNGKey(0)

    # (inplanes, planes, stride, N, H, W): first exercises the downsample path,
    # second exercises the identity-residual path.
    configs = [
        (64, 64, 2, 2, 16, 16),
        (256, 64, 1, 2, 8, 8),
    ]
    for idx, (inplanes, planes, stride, n, h, w) in enumerate(configs):
        kx, kp, key = jax.random.split(key, 3)
        x = jax.random.normal(kx, (n, h, w, inplanes), jnp.float32)
        params = init_params(kp, inplanes, planes, stride)

        out = jax.block_until_ready(bottleneck_forward(x, params, stride))
        ref = reference_forward(x, params, stride)

        assert out.shape == ref.shape == (n, h // stride, w // stride, 4 * planes)
        rel_err = jnp.max(jnp.abs(out - ref) / (jnp.abs(ref) + 1.0))
        assert rel_err < 5e-2, f"config {idx}: mismatch vs reference: {rel_err}"

    print("KERNEL_OK")
</pallas_src>

<mosaic_0001>
module attributes {stable_mosaic.version = 11 : i64} {
  func.func @_mm_bias_act_kernel(%arg0: i32, %arg1: i32, %arg2: memref<256x64xbf16, #tpu.memory_space<vmem>>, %arg3: memref<64x64xbf16, #tpu.memory_space<vmem>>, %arg4: memref<1x64xf32, #tpu.memory_space<vmem>>, %arg5: memref<256x64xbf16, #tpu.memory_space<vmem>>, %arg6: memref<256x64xf32, #tpu.memory_space<vmem>>) attributes {dimension_semantics = [#tpu.dimension_semantics<parallel>, #tpu.dimension_semantics<arbitrary>], iteration_bounds = array<i64: 2, 1>, scalar_prefetch = 0 : i64, scratch_operands = 1 : i64, tpu.core_type = #tpu.core_type<tc>, window_params = [{transform_indices = @transform_0, window_bounds = array<i64: 256, 64>}, {transform_indices = @transform_1, window_bounds = array<i64: 64, 64>}, {pipeline_mode = #tpu.pipeline_mode<synchronous>, transform_indices = @transform_2, window_bounds = array<i64: 1, 64>}, {transform_indices = @transform_3, window_bounds = array<i64: 256, 64>}]} {
    %c0_i32 = arith.constant 0 : i32
    %0 = arith.cmpi eq, %arg1, %c0_i32 : i32
    %1 = arith.extui %0 : i1 to i32
    %c0_i32_0 = arith.constant 0 : i32
    %2 = arith.cmpi ne, %1, %c0_i32_0 : i32
    scf.if %2 {
      %cst_10 = arith.constant 0.000000e+00 : f32
      %12 = vector.broadcast %cst_10 : f32 to vector<256x64xf32>
      %c0_11 = arith.constant 0 : index
      %c0_12 = arith.constant 0 : index
      %13 = vector.load %arg6[%c0_11, %c0_12] : memref<256x64xf32, #tpu.memory_space<vmem>>, vector<256x64xf32>
      tpu.vector_store %arg6[%c0_11, %c0_12], %12 {strides = array<i32>} : memref<256x64xf32, #tpu.memory_space<vmem>>, vector<256x64xf32>,
    } else {
    }
    %c0 = arith.constant 0 : index
    %c0_1 = arith.constant 0 : index
    %3 = vector.load %arg6[%c0, %c0_1] : memref<256x64xf32, #tpu.memory_space<vmem>>, vector<256x64xf32>
    %c0_2 = arith.constant 0 : index
    %c0_3 = arith.constant 0 : index
    %4 = vector.load %arg2[%c0_2, %c0_3] : memref<256x64xbf16, #tpu.memory_space<vmem>>, vector<256x64xbf16>
    %c0_4 = arith.constant 0 : index
    %c0_5 = arith.constant 0 : index
    %5 = vector.load %arg3[%c0_4, %c0_5] : memref<64x64xbf16, #tpu.memory_space<vmem>>, vector<64x64xbf16>
    %cst = arith.constant dense<0.000000e+00> : vector<256x64xf32>
    %6 = tpu.matmul %4, %5, %cst {dimension_numbers = #tpu.dot_dimension_numbers<[1], [0], [0], [1], [0, 0, 1, 1], [], []>} : vector<256x64xbf16>, vector<64x64xbf16>, vector<256x64xf32> -> vector<256x64xf32>
    %7 = arith.addf %3, %6 : vector<256x64xf32>
    %c0_6 = arith.constant 0 : index
    %c0_7 = arith.constant 0 : index
    %8 = vector.load %arg6[%c0_6, %c0_7] : memref<256x64xf32, #tpu.memory_space<vmem>>, vector<256x64xf32>
    tpu.vector_store %arg6[%c0_6, %c0_7], %7 {strides = array<i32>} : memref<256x64xf32, #tpu.memory_space<vmem>>, vector<256x64xf32>,
    %c0_i32_8 = arith.constant 0 : i32
    %9 = arith.cmpi eq, %arg1, %c0_i32_8 : i32
    %10 = arith.extui %9 : i1 to i32
    %c0_i32_9 = arith.constant 0 : i32
    %11 = arith.cmpi ne, %10, %c0_i32_9 : i32
    scf.if %11 {
      %c0_10 = arith.constant 0 : index
      %c0_11 = arith.constant 0 : index
      %12 = vector.load %arg6[%c0_10, %c0_11] : memref<256x64xf32, #tpu.memory_space<vmem>>, vector<256x64xf32>
      %c0_12 = arith.constant 0 : index
      %c0_13 = arith.constant 0 : index
      %13 = vector.load %arg4[%c0_12, %c0_13] : memref<1x64xf32, #tpu.memory_space<vmem>>, vector<1x64xf32>
      %14 = vector.broadcast %13 : vector<1x64xf32> to vector<256x64xf32>
      %15 = arith.addf %12, %14 : vector<256x64xf32>
      %cst_14 = arith.constant 0.000000e+00 : f32
      %16 = vector.broadcast %cst_14 : f32 to vector<256x64xf32>
      %17 = arith.maximumf %15, %16 : vector<256x64xf32>
      %18 = arith.truncf %17 : vector<256x64xf32> to vector<256x64xbf16>
      %c0_15 = arith.constant 0 : index
      %c0_16 = arith.constant 0 : index
      %19 = vector.load %arg5[%c0_15, %c0_16] : memref<256x64xbf16, #tpu.memory_space<vmem>>, vector<256x64xbf16>
      tpu.vector_store %arg5[%c0_15, %c0_16], %18 {strides = array<i32>} : memref<256x64xbf16, #tpu.memory_space<vmem>>, vector<256x64xbf16>,
    } else {
    }
    return
  }
  func.func @transform_0(%arg0: i32, %arg1: i32) -> (i32, i32) {
    %c0_i32 = arith.constant 0 : i32
    return %arg0, %arg1 : i32, i32
  }
  func.func @transform_1(%arg0: i32, %arg1: i32) -> (i32, i32) {
    %c0_i32 = arith.constant 0 : i32
    %c0_i32_0 = arith.constant 0 : i32
    return %arg1, %c0_i32 : i32, i32
  }
  func.func @transform_2(%arg0: i32, %arg1: i32) -> (i32, i32) {
    %c0_i32 = arith.constant 0 : i32
    %c0_i32_0 = arith.constant 0 : i32
    %c0_i32_1 = arith.constant 0 : i32
    return %c0_i32, %c0_i32_0 : i32, i32
  }
  func.func @transform_3(%arg0: i32, %arg1: i32) -> (i32, i32) {
    %c0_i32 = arith.constant 0 : i32
    %c0_i32_0 = arith.constant 0 : i32
    return %arg0, %c0_i32 : i32, i32
  }
}

</mosaic_0001>

<bundles_post_ra>
// kernel: tpu_custom_call.1
= control target key start
LH: loop header
LB: loop body
LE: loop exit
PB: predicated region body
PF: predicated region fallthrough
CT: control target
= control target key end

     0   :  { %s1328_s12 = smov 0   ;;  %s1330_s13 = smov 0   ;;  %s1581_s0 = inlined_call_operand.vmem [shape: bf16[512,64], index: 0, kind: input, shape index: {}]   ;;  %s1582_s1 = inlined_call_operand.vmem [shape: bf16[64,64], index: 1, kind: input, shape index: {}]   ;;  %s1583_s2 = inlined_call_operand.vmem [shape: f32[1,64], index: 2, kind: input, shape index: {}]   ;;  %s1584_s3 = inlined_call_operand.vmem [shape: bf16[512,64], index: 3, kind: output, shape index: {}]  }
   0x1   :  { %s1332_s14 = smov 0  }
   0x2 LB: > { %s25_s15 = sadd.s32 1, %s1301_s13  ;;  %p1062_p0 = scmp.ge.s32.totalorder %s1305_s14, 1  ;;  %s1305_s14 = sphi %s1332_s14, %s13_s14   ;;  %s1301_s13 = sphi %s1330_s13, %s1586_s13   ;;  %s1297_s12 = sphi %s1328_s12, %s1585_s12  }
   0x3   : > { %p27_p1 = scmp.ge.s32.totalorder %s25_s15, 2  ;;  %p166_p2 = scmp.lt.s32.totalorder %s1305_s14, 3 }
   0x5   : > { %s1588_s15 = smov (%p27_p1, %s25_s15), 0  ;;  %p167_p3 = pnand %p1062_p0, %p166_p2 }
   0x6   : > { %v1263_v0 = vld [vmem:[%s1582_s1] sm:$0xff] (!%p167_p3)   ;;  %s1063_s18 = sshll.u32 (!%p167_p3), %s1297_s12, 5  ;;  %v1264_v1 = vld [vmem:[%s1582_s1 + $0x8] sm:$0xff] (!%p167_p3)   ;;  %v1265_v2 = vld [vmem:[%s1582_s1 + $0x10] sm:$0xff] (!%p167_p3)   ;;  %vm224_vm0 = vcmask (!%p167_p3), 523264   ;;  %v1307_v3 = vmov (!%p167_p3), 0.0  }
   0x7   : > { %170 = sbr.rel (%p167_p3) target bundleno = 284 (0x11c), region = 32  ;;  %p199_p4 = scmp.lt.s32.totalorder (!%p167_p3), %s1063_s18, 63  ;;  %1190 = vmatprep.subr.bf16.mxu0 (!%p167_p3), %v1263_v0  ;;  %1230 = vmatprep.subr.bf16.mxu1 (!%p167_p3), %v1263_v0  ;;  %227 = vst.msk [vmem:[#allocation2 + $0x10] sm:$0xff] (!%p167_p3), %vm224_vm0, %v1307_v3  ;;  %225 = vst.msk [vmem:[#allocation2] sm:$0xff] (!%p167_p3), %vm224_vm0, %v1307_v3  ;;  %v1266_v4 = vld [vmem:[%s1582_s1 + $0x18] sm:$0xff] (!%p167_p3)   ;;  %vm941_vm1 = vcmask (!%p167_p3), 519168  }
   0x8   : > { %1191 = vmatpush3.bf16.msra.mxu0 (!%p167_p3), %v1263_v0  ;;  %1234 = vmatpush3.bf16.msra.mxu1 (!%p167_p3), %v1263_v0  ;;  %226 = vst.msk [vmem:[#allocation2 + $0x8] sm:$0xff] (!%p167_p3), %vm224_vm0, %v1307_v3  ;;  %228 = vst.msk [vmem:[#allocation2 + $0x18] sm:$0xff] (!%p167_p3), %vm224_vm0, %v1307_v3  ;;  %v1443_v49 = vld [vmem:[%s1583_s2] ss:$0 sm:$0xff] (!%p167_p3) }
   0x9   : > { %1192 = vmatprep.subr.bf16.mxu0 (!%p167_p3), %v1264_v1  ;;  %1231 = vmatprep.subr.bf16.mxu1 (!%p167_p3), %v1264_v1  ;;  %229 = vst.msk [vmem:[#allocation2 + $0x20] sm:$0xff] (!%p167_p3), %vm224_vm0, %v1307_v3  ;;  %230 = vst.msk [vmem:[#allocation2 + $0x28] sm:$0xff] (!%p167_p3), %vm224_vm0, %v1307_v3 }
   0xa   : > { %231 = vst.msk [vmem:[#allocation2 + $0x30] sm:$0xff] (!%p167_p3), %vm224_vm0, %v1307_v3  ;;  %232 = vst.msk [vmem:[#allocation2 + $0x38] sm:$0xff] (!%p167_p3), %vm224_vm0, %v1307_v3 }
   0xb   : > { %233 = vst.msk [vmem:[#allocation2 + $0x40] sm:$0xff] (!%p167_p3), %vm224_vm0, %v1307_v3  ;;  %234 = vst.msk [vmem:[#allocation2 + $0x48] sm:$0xff] (!%p167_p3), %vm224_vm0, %v1307_v3 }
   0xc   : > { %235 = vst.msk [vmem:[#allocation2 + $0x50] sm:$0xff] (!%p167_p3), %vm224_vm0, %v1307_v3  ;;  %236 = vst.msk [vmem:[#allocation2 + $0x58] sm:$0xff] (!%p167_p3), %vm224_vm0, %v1307_v3  ;;  %1193 = vmatpush3.bf16.msra.mxu0 (!%p167_p3), %v1264_v1  ;;  %1235 = vmatpush3.bf16.msra.mxu1 (!%p167_p3), %v1264_v1 }
   0xd   : > { %237 = vst.msk [vmem:[#allocation2 + $0x60] sm:$0xff] (!%p167_p3), %vm224_vm0, %v1307_v3  ;;  %238 = vst.msk [vmem:[#allocation2 + $0x68] sm:$0xff] (!%p167_p3), %vm224_vm0, %v1307_v3  ;;  %1194 = vmatprep.subr.bf16.mxu0 (!%p167_p3), %v1265_v2  ;;  %1232 = vmatprep.subr.bf16.mxu1 (!%p167_p3), %v1265_v2 }
   0xe   : > { %s1590_s18 = smov (!%p199_p4, %s1063_s18), 63  ;;  %239 = vst.msk [vmem:[#allocation2 + $0x70] sm:$0xff] %vm224_vm0, %v1307_v3  ;;  %240 = vst.msk [vmem:[#allocation2 + $0x78] sm:$0xff] %vm224_vm0, %v1307_v3  ;;  %v259_v21 = vld [vmem:[#allocation2 + $0x10] sm:$0xff]  ;;  %v257_v23 = vld [vmem:[#allocation2] sm:$0xff] }
   0xf   : > { %s1064_s23 = sshll.u32 %s1590_s18, 2  ;;  %241 = vst.msk [vmem:[#allocation2 + $0x80] sm:$0xff] %vm224_vm0, %v1307_v3  ;;  %242 = vst.msk [vmem:[#allocation2 + $0x88] sm:$0xff] %vm224_vm0, %v1307_v3  ;;  %v260_v27 = vld [vmem:[#allocation2 + $0x18] sm:$0xff]  ;;  %v258_v33 = vld [vmem:[#allocation2 + $0x8] sm:$0xff] }
  0x10   : > { %243 = vst.msk [vmem:[#allocation2 + $0x90] sm:$0xff] %vm224_vm0, %v1307_v3  ;;  %244 = vst.msk [vmem:[#allocation2 + $0x98] sm:$0xff] %vm224_vm0, %v1307_v3  ;;  %s1398_s28 = scalar_lea.vmem %s1581_s0, %s1064_s23  ;;  %1195 = vmatpush3.bf16.msra.mxu0 %v1265_v2  ;;  %1236 = vmatpush3.bf16.msra.mxu1 %v1265_v2  ;;  %v261_v47 = vld [vmem:[#allocation2 + $0x20] sm:$0xff]  ;;  %v262_v58 = vld [vmem:[#allocation2 + $0x28] sm:$0xff]  ;;  %s1462_s6 = scalar_lea.vmem %s1584_s3, %s1064_s23 }
  0x11   : > { %245 = vst.msk [vmem:[#allocation2 + $0xa0] sm:$0xff] %vm224_vm0, %v1307_v3  ;;  %246 = vst.msk [vmem:[#allocation2 + $0xa8] sm:$0xff] %vm224_vm0, %v1307_v3  ;;  %v1267_v5 = vld [vmem:[%s1398_s28] sm:$0xff]   ;;  %1196 = vmatprep.subr.bf16.mxu0 %v1266_v4  ;;  %1233 = vmatprep.subr.bf16.mxu1 %v1266_v4  ;;  %v1269_v7 = vld [vmem:[%s1398_s28 + $0x8] sm:$0xff]  }
  0x12   : > { %247 = vst.msk [vmem:[#allocation2 + $0xb0] sm:$0xff] %vm224_vm0, %v1307_v3  ;;  %248 = vst.msk [vmem:[#allocation2 + $0xb8] sm:$0xff] %vm224_vm0, %v1307_v3  ;;  %v1268_v6 = vld [vmem:[%s1398_s28 + $0x40] sm:$0xff]   ;;  %1198 = vmatprep.mubr.msk.bf16.mxu0 %vm224_vm0, %v1267_v5  ;;  %v1270_v8 = vld [vmem:[%s1398_s28 + $0x48] sm:$0xff]  }
  0x13   : > { %249 = vst.msk [vmem:[#allocation2 + $0xc0] sm:$0xff] %vm224_vm0, %v1307_v3  ;;  %250 = vst.msk [vmem:[#allocation2 + $0xc8] sm:$0xff] %vm224_vm0, %v1307_v3  ;;  %1214 = vmatprep.mubr.msk.bf16.mxu1 %vm224_vm0, %v1268_v6  ;;  %v1271_v9 = vld [vmem:[%s1398_s28 + $0x10] sm:$0xff]   ;;  %v1273_v11 = vld [vmem:[%s1398_s28 + $0x18] sm:$0xff]  }
  0x14   : > { %251 = vst.msk [vmem:[#allocation2 + $0xd0] sm:$0xff] %vm224_vm0, %v1307_v3  ;;  %252 = vst.msk [vmem:[#allocation2 + $0xd8] sm:$0xff] %vm224_vm0, %v1307_v3  ;;  %1197 = vmatpush3.bf16.msra.mxu0 %v1266_v4  ;;  %1237 = vmatpush3.bf16.msra.mxu1 %v1266_v4  ;;  %v1272_v10 = vld [vmem:[%s1398_s28 + $0x50] sm:$0xff]   ;;  %v1274_v12 = vld [vmem:[%s1398_s28 + $0x58] sm:$0xff]  }
  0x15   : > { %253 = vst.msk [vmem:[#allocation2 + $0xe0] sm:$0xff] %vm224_vm0, %v1307_v3  ;;  %254 = vst.msk [vmem:[#allocation2 + $0xe8] sm:$0xff] %vm224_vm0, %v1307_v3  ;;  %v1275_v13 = vld [vmem:[%s1398_s28 + $0x20] sm:$0xff]   ;;  %v1277_v15 = vld [vmem:[%s1398_s28 + $0x28] sm:$0xff]  }
  0x16   : > { %255 = vst.msk [vmem:[#allocation2 + $0xf0] sm:$0xff] %vm224_vm0, %v1307_v3  ;;  %256 = vst.msk [vmem:[#allocation2 + $0xf8] sm:$0xff] %vm224_vm0, %v1307_v3  ;;  %v1276_v14 = vld [vmem:[%s1398_s28 + $0x60] sm:$0xff]   ;;  %v1278_v16 = vld [vmem:[%s1398_s28 + $0x68] sm:$0xff]  }
  0x17   : > { %1199 = vmatmul.mubr.msk.bf16.vlgmr.msra.gmra.mrb[0].mxu0 %vm224_vm0, %v1269_v7  ;;  %1215 = vmatmul.mubr.msk.bf16.vlgmr.msra.gmra.mrb[0].mxu1 %vm224_vm0, %v1270_v8  ;;  %v1279_v17 = vld [vmem:[%s1398_s28 + $0x30] sm:$0xff]   ;;  %v1281_v19 = vld [vmem:[%s1398_s28 + $0x38] sm:$0xff]   ;;  %v273_v24 = vld [vmem:[#allocation2 + $0x80] sm:$0xff] }
  0x18   : > { %1202 = vmatprep.mubr.msk.bf16.mxu0 %vm224_vm0, %v1271_v9  ;;  %1218 = vmatprep.mubr.msk.bf16.mxu1 %vm224_vm0, %v1272_v10  ;;  %v1280_v18 = vld [vmem:[%s1398_s28 + $0x70] sm:$0xff]   ;;  %v1282_v20 = vld [vmem:[%s1398_s28 + $0x78] sm:$0xff]   ;;  %v274_v34 = vld [vmem:[#allocation2 + $0x88] sm:$0xff] }
  0x19   : > { %v275_v22 = vld [vmem:[#allocation2 + $0x90] sm:$0xff]  ;;  %v276_v28 = vld [vmem:[#allocation2 + $0x98] sm:$0xff]  ;;  %v277_v48 = vld [vmem:[#allocation2 + $0xa0] sm:$0xff] }
  0x1a   : > { %v263_v45 = vld [vmem:[#allocation2 + $0x30] sm:$0xff]  ;;  %v264_v52 = vld [vmem:[#allocation2 + $0x38] sm:$0xff]  ;;  %v278_v59 = vld [vmem:[#allocation2 + $0xa8] sm:$0xff] }
  0x1b   : > { %v279_v46 = vld [vmem:[#allocation2 + $0xb0] sm:$0xff]  ;;  %v280_v53 = vld [vmem:[#allocation2 + $0xb8] sm:$0xff] }
  0x1f   : > { %1203 = vmatmul.mubr.msk.bf16.gmra.mrb[4].mxu0 %vm224_vm0, %v1273_v11  ;;  %1219 = vmatmul.mubr.msk.bf16.gmra.mrb[4].mxu1 %vm224_vm0, %v1274_v12 }
  0x20   : > { %1206 = vmatprep.mubr.msk.bf16.mxu0 %vm224_vm0, %v1275_v13  ;;  %1222 = vmatprep.mubr.msk.bf16.mxu1 %vm224_vm0, %v1276_v14 }
  0x27   : > { %1207 = vmatmul.mubr.msk.bf16.gmra.mrb[8].mxu0 %vm224_vm0, %v1277_v15  ;;  %1223 = vmatmul.mubr.msk.bf16.gmra.mrb[8].mxu1 %vm224_vm0, %v1278_v16 }
  0x28   : > { %1210 = vmatprep.mubr.msk.bf16.mxu0 %vm224_vm0, %v1279_v17  ;;  %1226 = vmatprep.mubr.msk.bf16.mxu1 %vm224_vm0, %v1280_v18 }
  0x2f   : > { %1211 = vmatmul.mubr.msk.bf16.gmra.mrb[12].mxu0 %vm224_vm0, %v1281_v19  ;;  %1227 = vmatmul.mubr.msk.bf16.gmra.mrb[12].mxu1 %vm224_vm0, %v1282_v20 }
  0xea   : > { %v1200_v25 = vpop.f32.mrb[0].mxu0  ;;  %v1216_v26 = vpop.f32.mrb[0].mxu1 }
  0xeb   : > { %v645_v29 = vadd.f32 %v1200_v25, %v259_v21  ;;  %v661_v30 = vadd.f32 %v1216_v26, %v275_v22  ;;  %v516_v31 = vpop.f32.mrb[1].mxu0  ;;  %v580_v32 = vpop.f32.mrb[1].mxu1  ;;  %v267_v26 = vld [vmem:[#allocation2 + $0x50] sm:$0xff] }
  0xec   : > { %v643_v35 = vadd.f32 %v516_v31, %v257_v23  ;;  %v659_v36 = vadd.f32 %v580_v32, %v273_v24  ;;  %v1201_v37 = vpop.f32.mrb[2].mxu0  ;;  %v1217_v38 = vpop.f32.mrb[2].mxu1  ;;  %v265_v32 = vld [vmem:[#allocation2 + $0x40] sm:$0xff] }
  0xed   : > { %677 = vst.msk [vmem:[#allocation2 + $0x10] sm:$0xff] %vm224_vm0, %v645_v29  ;;  %693 = vst.msk [vmem:[#allocation2 + $0x90] sm:$0xff] %vm224_vm0, %v661_v30  ;;  %v646_v39 = vadd.f32 %v1201_v37, %v260_v27  ;;  %v662_v40 = vadd.f32 %v1217_v38, %v276_v28  ;;  %v519_v41 = vpop.f32.mrb[3].mxu0  ;;  %v583_v42 = vpop.f32.mrb[3].mxu1  ;;  %v283_v27 = vld [vmem:[#allocation2 + $0xd0] sm:$0xff] }
  0xee   : > { %675 = vst.msk [vmem:[#allocation2] sm:$0xff] %vm224_vm0, %v643_v35  ;;  %691 = vst.msk [vmem:[#allocation2 + $0x80] sm:$0xff] %vm224_vm0, %v659_v36  ;;  %v644_v43 = vadd.f32 %v519_v41, %v258_v33  ;;  %v660_v44 = vadd.f32 %v583_v42, %v274_v34  ;;  %v281_v33 = vld [vmem:[#allocation2 + $0xc0] sm:$0xff]  ;;  %v284_v41 = vld [vmem:[#allocation2 + $0xd8] sm:$0xff] }
  0xef   : > { %678 = vst.msk [vmem:[#allocation2 + $0x18] sm:$0xff] %vm224_vm0, %v646_v39  ;;  %694 = vst.msk [vmem:[#allocation2 + $0x98] sm:$0xff] %vm224_vm0, %v662_v40  ;;  %v268_v40 = vld [vmem:[#allocation2 + $0x58] sm:$0xff] }
  0xf0   : > { %676 = vst.msk [vmem:[#allocation2 + $0x8] sm:$0xff] %vm224_vm0, %v644_v43  ;;  %692 = vst.msk [vmem:[#allocation2 + $0x88] sm:$0xff] %vm224_vm0, %v660_v44 }
  0xf2   : > { %v1204_v50 = vpop.f32.mrb[4].mxu0  ;;  %v1220_v51 = vpop.f32.mrb[4].mxu1 }
  0xf3   : > { %v649_v54 = vadd.f32 %v1204_v50, %v263_v45  ;;  %v665_v55 = vadd.f32 %v1220_v51, %v279_v46  ;;  %v532_v56 = vpop.f32.mrb[5].mxu0  ;;  %v596_v57 = vpop.f32.mrb[5].mxu1  ;;  %v282_v50 = vld [vmem:[#allocation2 + $0xc8] sm:$0xff] }
  0xf4   : > { %v712_v60 = vld [vmem:[#allocation2 + $0x10] sm:$0xff]  ;;  %v647_v62 = vadd.f32 %v532_v56, %v261_v47  ;;  %v663_v63 = vadd.f32 %v596_v57, %v277_v48  ;;  %v1205_v0 = vpop.f32.mrb[6].mxu0  ;;  %v1221_v1 = vpop.f32.mrb[6].mxu1  ;;  %v266_v48 = vld [vmem:[#allocation2 + $0x48] sm:$0xff] }
  0xf5   : > { %v728_v61 = vld [vmem:[#allocation2 + $0x90] sm:$0xff]  ;;  %v751_v2 = vadd.f32 %v1443_v49, %v712_v60  ;;  %v710_v4 = vld [vmem:[#allocation2] sm:$0xff]  ;;  %681 = vst.msk [vmem:[#allocation2 + $0x30] sm:$0xff] %vm224_vm0, %v649_v54  ;;  %697 = vst.msk [vmem:[#allocation2 + $0xb0] sm:$0xff] %vm224_vm0, %v665_v55  ;;  %v650_v6 = vadd.f32 %v1205_v0, %v264_v52  ;;  %v666_v7 = vadd.f32 %v1221_v1, %v280_v53  ;;  %v535_v8 = vpop.f32.mrb[7].mxu0  ;;  %v599_v9 = vpop.f32.mrb[7].mxu1 }
  0xf6   : > { %v767_v3 = vadd.f32 %v1443_v49, %v728_v61  ;;  %v726_v5 = vld [vmem:[#allocation2 + $0x80] sm:$0xff]  ;;  %v749_v10 = vadd.f32 %v1443_v49, %v710_v4  ;;  %v713_v12 = vld [vmem:[#allocation2 + $0x18] sm:$0xff]  ;;  %679 = vst.msk [vmem:[#allocation2 + $0x20] sm:$0xff] %vm224_vm0, %v647_v62  ;;  %695 = vst.msk [vmem:[#allocation2 + $0xa0] sm:$0xff] %vm224_vm0, %v663_v63  ;;  %v648_v14 = vadd.f32 %v535_v8, %v262_v58 }
  0xf7   : > { %v765_v11 = vadd.f32 %v1443_v49, %v726_v5  ;;  %v729_v13 = vld [vmem:[#allocation2 + $0x98] sm:$0xff]  ;;  %v664_v15 = vadd.f32 %v599_v9, %v278_v59  ;;  %v783_v16 = vmax.f32 %v751_v2, 0.0  ;;  %v752_v18 = vadd.f32 %v1443_v49, %v713_v12  ;;  %v711_v20 = vld [vmem:[#allocation2 + $0x8] sm:$0xff]  ;;  %682 = vst.msk [vmem:[#allocation2 + $0x38] sm:$0xff] %vm224_vm0, %v650_v6  ;;  %698 = vst.msk [vmem:[#allocation2 + $0xb8] sm:$0xff] %vm224_vm0, %v666_v7 }
  0xf8   : > { %v799_v17 = vmax.f32 %v767_v3, 0.0  ;;  %v768_v19 = vadd.f32 %v1443_v49, %v729_v13  ;;  %v727_v21 = vld [vmem:[#allocation2 + $0x88] sm:$0xff]  ;;  %v781_v22 = vmax.f32 %v749_v10, 0.0  ;;  %v750_v24 = vadd.f32 %v1443_v49, %v711_v20  ;;  %680 = vst.msk [vmem:[#allocation2 + $0x28] sm:$0xff] %vm224_vm0, %v648_v14  ;;  %v287_v20 = vld [vmem:[#allocation2 + $0xf0] sm:$0xff] }
  0xf9   : > { %v797_v23 = vmax.f32 %v765_v11, 0.0  ;;  %v766_v25 = vadd.f32 %v1443_v49, %v727_v21  ;;  %696 = vst.msk [vmem:[#allocation2 + $0xa8] sm:$0xff] %vm224_vm0, %v664_v15  ;;  %v1140_v28 = vpack.c.bf16 %v783_v16, %v783_v16  ;;  %v784_v30 = vmax.f32 %v752_v18, 0.0 }
  0xfa   : > { %v1156_v29 = vpack.c.bf16 %v799_v17, %v799_v17  ;;  %v800_v31 = vmax.f32 %v768_v19, 0.0  ;;  %v1138_v34 = vpack.c.bf16 %v781_v22, %v781_v22  ;;  %v782_v36 = vmax.f32 %v750_v24, 0.0  ;;  %v1208_v38 = vpop.f32.mrb[8].mxu0  ;;  %v1224_v39 = vpop.f32.mrb[8].mxu1  ;;  %v271_v19 = vld [vmem:[#allocation2 + $0x70] sm:$0xff] }
  0xfb   : > { %v1154_v35 = vpack.c.bf16 %v797_v23, %v797_v23  ;;  %v798_v37 = vmax.f32 %v766_v25, 0.0  ;;  %944 = vst.msk [vmem:[%s1462_s6 + $0x8] sm:$0xf] %vm941_vm1, %v1140_v28  ;;  %v1141_v42 = vpack.c.bf16 %v784_v30, %v784_v30  ;;  %v653_v44 = vadd.f32 %v1208_v38, %v267_v26  ;;  %v548_v46 = vpop.f32.mrb[9].mxu0  ;;  %v612_v47 = vpop.f32.mrb[9].mxu1  ;;  %v269_v25 = vld [vmem:[#allocation2 + $0x60] sm:$0xff] }
  0xfc   : > { %960 = vst.msk [vmem:[%s1462_s6 + $0x48] sm:$0xf] %vm941_vm1, %v1156_v29  ;;  %v1157_v43 = vpack.c.bf16 %v800_v31, %v800_v31  ;;  %v669_v45 = vadd.f32 %v1224_v39, %v283_v27  ;;  %942 = vst.msk [vmem:[%s1462_s6] sm:$0xf] %vm941_vm1, %v1138_v34  ;;  %v1139_v51 = vpack.c.bf16 %v782_v36, %v782_v36  ;;  %v716_v53 = vld [vmem:[#allocation2 + $0x30] sm:$0xff]  ;;  %v1209_v57 = vpop.f32.mrb[10].mxu0 }
  0xfd   : > { %958 = vst.msk [vmem:[%s1462_s6 + $0x40] sm:$0xf] %vm941_vm1, %v1154_v35  ;;  %v1155_v52 = vpack.c.bf16 %v798_v37, %v798_v37  ;;  %v732_v54 = vld [vmem:[#allocation2 + $0xb0] sm:$0xff]  ;;  %v651_v55 = vadd.f32 %v548_v46, %v265_v32  ;;  %v667_v56 = vadd.f32 %v612_v47, %v281_v33  ;;  %v1225_v58 = vpop.f32.mrb[10].mxu1  ;;  %945 = vst.msk [vmem:[%s1462_s6 + $0xc] sm:$0xf] %vm941_vm1, %v1141_v42 }
  0xfe   : > { %961 = vst.msk [vmem:[%s1462_s6 + $0x4c] sm:$0xf] %vm941_vm1, %v1157_v43  ;;  %v755_v59 = vadd.f32 %v1443_v49, %v716_v53  ;;  %v771_v60 = vadd.f32 %v1443_v49, %v732_v54  ;;  %v714_v61 = vld [vmem:[#allocation2 + $0x20] sm:$0xff]  ;;  %v654_v63 = vadd.f32 %v1209_v57, %v268_v40  ;;  %v670_v0 = vadd.f32 %v1225_v58, %v284_v41  ;;  %v551_v1 = vpop.f32.mrb[11].mxu0  ;;  %v615_v2 = vpop.f32.mrb[11].mxu1  ;;  %v717_v5 = vld [vmem:[#allocation2 + $0x38] sm:$0xff] }
  0xff   : > { %v730_v62 = vld [vmem:[#allocation2 + $0xa0] sm:$0xff]  ;;  %685 = vst.msk [vmem:[#allocation2 + $0x50] sm:$0xff] %vm224_vm0, %v653_v44  ;;  %701 = vst.msk [vmem:[#allocation2 + $0xd0] sm:$0xff] %vm224_vm0, %v669_v45  ;;  %v753_v3 = vadd.f32 %v1443_v49, %v714_v61  ;;  %v733_v6 = vld [vmem:[#allocation2 + $0xb8] sm:$0xff]  ;;  %v652_v7 = vadd.f32 %v551_v1, %v266_v48  ;;  %v668_v8 = vadd.f32 %v615_v2, %v282_v50 }
 0x100   : > { %943 = vst.msk [vmem:[%s1462_s6 + $0x4] sm:$0xf] %vm941_vm1, %v1139_v51  ;;  %959 = vst.msk [vmem:[%s1462_s6 + $0x44] sm:$0xf] %vm941_vm1, %v1155_v52  ;;  %v769_v4 = vadd.f32 %v1443_v49, %v730_v62  ;;  %v787_v9 = vmax.f32 %v755_v59, 0.0  ;;  %v803_v10 = vmax.f32 %v771_v60, 0.0  ;;  %v756_v11 = vadd.f32 %v1443_v49, %v717_v5 }
 0x101   : > { %683 = vst.msk [vmem:[#allocation2 + $0x40] sm:$0xff] %vm224_vm0, %v651_v55  ;;  %699 = vst.msk [vmem:[#allocation2 + $0xc0] sm:$0xff] %vm224_vm0, %v667_v56  ;;  %v772_v12 = vadd.f32 %v1443_v49, %v733_v6  ;;  %v715_v13 = vld [vmem:[#allocation2 + $0x28] sm:$0xff]  ;;  %v785_v15 = vmax.f32 %v753_v3, 0.0  ;;  %v285_v26 = vld [vmem:[#allocation2 + $0xe0] sm:$0xff] }
 0x102   : > { %v731_v14 = vld [vmem:[#allocation2 + $0xa8] sm:$0xff]  ;;  %686 = vst.msk [vmem:[#allocation2 + $0x58] sm:$0xff] %vm224_vm0, %v654_v63  ;;  %702 = vst.msk [vmem:[#allocation2 + $0xd8] sm:$0xff] %vm224_vm0, %v670_v0  ;;  %v801_v16 = vmax.f32 %v769_v4, 0.0  ;;  %v754_v17 = vadd.f32 %v1443_v49, %v715_v13  ;;  %v1144_v21 = vpack.c.bf16 %v787_v9, %v787_v9  ;;  %v1160_v22 = vpack.c.bf16 %v803_v10, %v803_v10  ;;  %v1212_v31 = vpop.f32.mrb[12].mxu0  ;;  %v1228_v32 = vpop.f32.mrb[12].mxu1 }
 0x103   : > { %v770_v18 = vadd.f32 %v1443_v49, %v731_v14  ;;  %684 = vst.msk [vmem:[#allocation2 + $0x48] sm:$0xff] %vm224_vm0, %v652_v7  ;;  %700 = vst.msk [vmem:[#allocation2 + $0xc8] sm:$0xff] %vm224_vm0, %v668_v8  ;;  %v788_v23 = vmax.f32 %v756_v11, 0.0  ;;  %v804_v24 = vmax.f32 %v772_v12, 0.0  ;;  %v1142_v27 = vpack.c.bf16 %v785_v15, %v785_v15  ;;  %v272_v33 = vld [vmem:[#allocation2 + $0x78] sm:$0xff]  ;;  %v564_v39 = vpop.f32.mrb[13].mxu0 }
 0x104   : > { %v1158_v28 = vpack.c.bf16 %v801_v16, %v801_v16  ;;  %v786_v29 = vmax.f32 %v754_v17, 0.0  ;;  %v288_v34 = vld [vmem:[#allocation2 + $0xf8] sm:$0xff]  ;;  %948 = vst.msk [vmem:[%s1462_s6 + $0x18] sm:$0xf] %vm941_vm1, %v1144_v21  ;;  %964 = vst.msk [vmem:[%s1462_s6 + $0x58] sm:$0xf] %vm941_vm1, %v1160_v22  ;;  %v657_v37 = vadd.f32 %v1212_v31, %v271_v19  ;;  %v673_v38 = vadd.f32 %v1228_v32, %v287_v20 }
 0x105   : > { %v802_v30 = vmax.f32 %v770_v18, 0.0  ;;  %v1145_v35 = vpack.c.bf16 %v788_v23, %v788_v23  ;;  %v1161_v36 = vpack.c.bf16 %v804_v24, %v804_v24  ;;  %v628_v40 = vpop.f32.mrb[13].mxu1  ;;  %v270_v41 = vld [vmem:[#allocation2 + $0x68] sm:$0xff]  ;;  %946 = vst.msk [vmem:[%s1462_s6 + $0x10] sm:$0xf] %vm941_vm1, %v1142_v27  ;;  %v655_v47 = vadd.f32 %v564_v39, %v269_v25  ;;  %v1213_v50 = vpop.f32.mrb[14].mxu0 }
 0x106   : > { %v286_v42 = vld [vmem:[#allocation2 + $0xe8] sm:$0xff]  ;;  %962 = vst.msk [vmem:[%s1462_s6 + $0x50] sm:$0xf] %vm941_vm1, %v1158_v28  ;;  %v1143_v43 = vpack.c.bf16 %v786_v29, %v786_v29  ;;  %v720_v45 = vld [vmem:[#allocation2 + $0x50] sm:$0xff]  ;;  %v671_v48 = vadd.f32 %v628_v40, %v285_v26  ;;  %v1229_v51 = vpop.f32.mrb[14].mxu1  ;;  %v658_v56 = vadd.f32 %v1213_v50, %v272_v33  ;;  %v567_v58 = vpop.f32.mrb[15].mxu0 }
 0x107   : > { %v1159_v44 = vpack.c.bf16 %v802_v30, %v802_v30  ;;  %v736_v46 = vld [vmem:[#allocation2 + $0xd0] sm:$0xff]  ;;  %949 = vst.msk [vmem:[%s1462_s6 + $0x1c] sm:$0xf] %vm941_vm1, %v1145_v35  ;;  %965 = vst.msk [vmem:[%s1462_s6 + $0x5c] sm:$0xf] %vm941_vm1, %v1161_v36  ;;  %v759_v52 = vadd.f32 %v1443_v49, %v720_v45  ;;  %v674_v57 = vadd.f32 %v1229_v51, %v288_v34  ;;  %v631_v59 = vpop.f32.mrb[15].mxu1 }
 0x108   : > { %v775_v53 = vadd.f32 %v1443_v49, %v736_v46  ;;  %v718_v54 = vld [vmem:[#allocation2 + $0x40] sm:$0xff]  ;;  %689 = vst.msk [vmem:[#allocation2 + $0x70] sm:$0xff] %vm224_vm0, %v657_v37  ;;  %705 = vst.msk [vmem:[#allocation2 + $0xf0] sm:$0xff] %vm224_vm0, %v673_v38  ;;  %v656_v0 = vadd.f32 %v567_v58, %v270_v41  ;;  %v672_v1 = vadd.f32 %v631_v59, %v286_v42 }
 0x109   : > { %v734_v55 = vld [vmem:[#allocation2 + $0xc0] sm:$0xff]  ;;  %947 = vst.msk [vmem:[%s1462_s6 + $0x14] sm:$0xf] %vm941_vm1, %v1143_v43  ;;  %963 = vst.msk [vmem:[%s1462_s6 + $0x54] sm:$0xf] %vm941_vm1, %v1159_v44  ;;  %v757_v60 = vadd.f32 %v1443_v49, %v718_v54  ;;  %v721_v62 = vld [vmem:[#allocation2 + $0x58] sm:$0xff] }
 0x10a   : > { %v773_v61 = vadd.f32 %v1443_v49, %v734_v55  ;;  %v737_v63 = vld [vmem:[#allocation2 + $0xd8] sm:$0xff]  ;;  %687 = vst.msk [vmem:[#allocation2 + $0x60] sm:$0xff] %vm224_vm0, %v655_v47  ;;  %703 = vst.msk [vmem:[#allocation2 + $0xe0] sm:$0xff] %vm224_vm0, %v671_v48  ;;  %v791_v2 = vmax.f32 %v759_v52, 0.0  ;;  %v807_v3 = vmax.f32 %v775_v53, 0.0  ;;  %v760_v4 = vadd.f32 %v1443_v49, %v721_v62  ;;  %v719_v6 = vld [vmem:[#allocation2 + $0x48] sm:$0xff] }
 0x10b   : > { %v776_v5 = vadd.f32 %v1443_v49, %v737_v63  ;;  %v735_v7 = vld [vmem:[#allocation2 + $0xc8] sm:$0xff]  ;;  %690 = vst.msk [vmem:[#allocation2 + $0x78] sm:$0xff] %vm224_vm0, %v658_v56  ;;  %706 = vst.msk [vmem:[#allocation2 + $0xf8] sm:$0xff] %vm224_vm0, %v674_v57  ;;  %v789_v8 = vmax.f32 %v757_v60, 0.0  ;;  %v758_v10 = vadd.f32 %v1443_v49, %v719_v6 }
 0x10c   : > { %v805_v9 = vmax.f32 %v773_v61, 0.0  ;;  %v774_v11 = vadd.f32 %v1443_v49, %v735_v7  ;;  %688 = vst.msk [vmem:[#allocation2 + $0x68] sm:$0xff] %vm224_vm0, %v656_v0  ;;  %704 = vst.msk [vmem:[#allocation2 + $0xe8] sm:$0xff] %vm224_vm0, %v672_v1  ;;  %v1148_v12 = vpack.c.bf16 %v791_v2, %v791_v2  ;;  %v1164_v13 = vpack.c.bf16 %v807_v3, %v807_v3 }
 0x10d   : > { %v792_v14 = vmax.f32 %v760_v4, 0.0  ;;  %v808_v15 = vmax.f32 %v776_v5, 0.0  ;;  %v1146_v16 = vpack.c.bf16 %v789_v8, %v789_v8  ;;  %v790_v18 = vmax.f32 %v758_v10, 0.0 }
 0x10e   : > { %v1162_v17 = vpack.c.bf16 %v805_v9, %v805_v9  ;;  %v806_v19 = vmax.f32 %v774_v11, 0.0  ;;  %952 = vst.msk [vmem:[%s1462_s6 + $0x28] sm:$0xf] %vm941_vm1, %v1148_v12  ;;  %968 = vst.msk [vmem:[%s1462_s6 + $0x68] sm:$0xf] %vm941_vm1, %v1164_v13 }
 0x10f   : > { %v1149_v20 = vpack.c.bf16 %v792_v14, %v792_v14  ;;  %v1165_v21 = vpack.c.bf16 %v808_v15, %v808_v15  ;;  %950 = vst.msk [vmem:[%s1462_s6 + $0x20] sm:$0xf] %vm941_vm1, %v1146_v16  ;;  %v1147_v22 = vpack.c.bf16 %v790_v18, %v790_v18  ;;  %v724_v24 = vld [vmem:[#allocation2 + $0x70] sm:$0xff] }
 0x110   : > { %966 = vst.msk [vmem:[%s1462_s6 + $0x60] sm:$0xf] %vm941_vm1, %v1162_v17  ;;  %v1163_v23 = vpack.c.bf16 %v806_v19, %v806_v19  ;;  %v740_v25 = vld [vmem:[#allocation2 + $0xf0] sm:$0xff]  ;;  %v763_v26 = vadd.f32 %v1443_v49, %v724_v24 }
 0x111   : > { %953 = vst.msk [vmem:[%s1462_s6 + $0x2c] sm:$0xf] %vm941_vm1, %v1149_v20  ;;  %969 = vst.msk [vmem:[%s1462_s6 + $0x6c] sm:$0xf] %vm941_vm1, %v1165_v21  ;;  %v779_v27 = vadd.f32 %v1443_v49, %v740_v25  ;;  %v722_v28 = vld [vmem:[#allocation2 + $0x60] sm:$0xff] }
 0x112   : > { %v738_v29 = vld [vmem:[#allocation2 + $0xe0] sm:$0xff]  ;;  %951 = vst.msk [vmem:[%s1462_s6 + $0x24] sm:$0xf] %vm941_vm1, %v1147_v22  ;;  %967 = vst.msk [vmem:[%s1462_s6 + $0x64] sm:$0xf] %vm941_vm1, %v1163_v23  ;;  %v761_v30 = vadd.f32 %v1443_v49, %v722_v28  ;;  %v725_v32 = vld [vmem:[#allocation2 + $0x78] sm:$0xff] }
 0x113   : > { %v777_v31 = vadd.f32 %v1443_v49, %v738_v29  ;;  %v741_v33 = vld [vmem:[#allocation2 + $0xf8] sm:$0xff]  ;;  %v795_v34 = vmax.f32 %v763_v26, 0.0  ;;  %v811_v35 = vmax.f32 %v779_v27, 0.0  ;;  %v764_v36 = vadd.f32 %v1443_v49, %v725_v32  ;;  %v723_v38 = vld [vmem:[#allocation2 + $0x68] sm:$0xff] }
 0x114   : > { %v780_v37 = vadd.f32 %v1443_v49, %v741_v33  ;;  %v739_v39 = vld [vmem:[#allocation2 + $0xe8] sm:$0xff]  ;;  %v793_v40 = vmax.f32 %v761_v30, 0.0  ;;  %v762_v42 = vadd.f32 %v1443_v49, %v723_v38 }
 0x115   : > { %v809_v41 = vmax.f32 %v777_v31, 0.0  ;;  %v778_v43 = vadd.f32 %v1443_v49, %v739_v39  ;;  %v1152_v44 = vpack.c.bf16 %v795_v34, %v795_v34  ;;  %v1168_v45 = vpack.c.bf16 %v811_v35, %v811_v35 }
 0x116   : > { %v796_v46 = vmax.f32 %v764_v36, 0.0  ;;  %v812_v47 = vmax.f32 %v780_v37, 0.0  ;;  %v1150_v48 = vpack.c.bf16 %v793_v40, %v793_v40  ;;  %v794_v51 = vmax.f32 %v762_v42, 0.0 }
 0x117   : > { %v1166_v50 = vpack.c.bf16 %v809_v41, %v809_v41  ;;  %v810_v52 = vmax.f32 %v778_v43, 0.0  ;;  %956 = vst.msk [vmem:[%s1462_s6 + $0x38] sm:$0xf] %vm941_vm1, %v1152_v44  ;;  %972 = vst.msk [vmem:[%s1462_s6 + $0x78] sm:$0xf] %vm941_vm1, %v1168_v45 }
 0x118   : > { %v1153_v53 = vpack.c.bf16 %v796_v46, %v796_v46  ;;  %v1169_v54 = vpack.c.bf16 %v812_v47, %v812_v47  ;;  %954 = vst.msk [vmem:[%s1462_s6 + $0x30] sm:$0xf] %vm941_vm1, %v1150_v48  ;;  %v1151_v49 = vpack.c.bf16 %v794_v51, %v794_v51 }
 0x119   : > { %970 = vst.msk [vmem:[%s1462_s6 + $0x70] sm:$0xf] %vm941_vm1, %v1166_v50  ;;  %v1167_v55 = vpack.c.bf16 %v810_v52, %v810_v52 }
 0x11a   : > { %957 = vst.msk [vmem:[%s1462_s6 + $0x3c] sm:$0xf] %vm941_vm1, %v1153_v53  ;;  %973 = vst.msk [vmem:[%s1462_s6 + $0x7c] sm:$0xf] %vm941_vm1, %v1169_v54 }
 0x11b   : > { %955 = vst.msk [vmem:[%s1462_s6 + $0x34] sm:$0xf] %vm941_vm1, %v1151_v49  ;;  %971 = vst.msk [vmem:[%s1462_s6 + $0x74] sm:$0xf] %vm941_vm1, %v1167_v55 }
 0x11c PF: > { %s13_s14 = sadd.s32 1, %s1305_s14   ;;  %s1585_s12 = smov %s1301_s13 }
 0x11d   : > { %p10_p5 = scmp.ge.s32.totalorder %s13_s14, 4   ;;  %s1586_s13 = smov %s1588_s15 }
 0x11f   :  { %12 = sbr.rel (!%p10_p5) target bundleno = 2 (0x2), region = 73 }

</bundles_post_ra>
